<compile_context>
chip_gen: v7x
topology: tpu7x:2x2x1
jax: 0.10.0
libtpu: 0.0.40
codegen_flags: <defaults>
</compile_context>

<pallas_src>
import jax
import jax.numpy as jnp
from jax import lax
from jax.experimental import pallas as pl
from jax.experimental.pallas import tpu as pltpu


# ----------------------------- Pallas kernel ------------------------------- #

def hybrid_kernel(patches_ref, w_ref, pool_ref, c_ref, out_ref):
    # patches_ref: (K1, BHW)   lane-dense 3x3 patches, last row = ones (bias)
    # w_ref:       (D, K1)     conv weights, last column = bias
    # pool_ref:    (Bpad, BHW) block-averaging matrix for global average pool
    # c_ref:       (D, Npad)   pre-normalized centroids, lane-dense in N
    # out_ref:     (Bpad, Npad)
    # Conv3x3 (+bias, folded) as a matmul with the big axis (BHW) in lanes.
    yT = lax.dot_general(w_ref[...], patches_ref[...],
                         (((1,), (0,)), ((), ())),
                         preferred_element_type=jnp.float32)        # (D, BHW)
    yT = jnp.maximum(yT, 0.0)                                       # ReLU
    # Global average pool as an MXU matmul contracting the lane (BHW) dims.
    f = lax.dot_general(pool_ref[...], yT,
                        (((1,), (1,)), ((), ())),
                        preferred_element_type=jnp.float32)         # (Bpad, D)
    # Raw similarity vs. pre-normalized centroids, then per-row feature norm.
    s = jnp.dot(f, c_ref[...], preferred_element_type=jnp.float32)  # (Bpad, Npad)
    f_inv = lax.rsqrt(jnp.sum(f * f, axis=-1, keepdims=True) + 1e-12)  # (Bpad, 1)
    out_ref[...] = s * f_inv


# ------------------------------ JAX wrapper -------------------------------- #

def _im2col_3x3_t(x_nhwc):
    """(B,H,W,C) -> (9*C+1, B*H*W): 3x3 SAME patches, transposed (lane-dense),
    with a trailing ones row so the conv bias folds into the matmul."""
    B, H, W, C = x_nhwc.shape
    xp = jnp.pad(x_nhwc, ((0, 0), (1, 1), (1, 1), (0, 0)))
    cols = [xp[:, dy:dy + H, dx:dx + W, :] for dy in range(3) for dx in range(3)]
    p = jnp.stack(cols, axis=0)                                   # (9, B, H, W, C)
    p = jnp.moveaxis(p, -1, 1).reshape(9 * C, B * H * W)          # rows (dy,dx,c)
    ones = jnp.ones((1, B * H * W), x_nhwc.dtype)
    return jnp.concatenate([p, ones], axis=0)                     # (9*C+1, B*HW)


def make_hybrid_forward(conv_w, conv_b, centroids, B, H, W):
    """Precompute static weight-side tensors once and return a jitted forward."""
    KH, KW, C, D = conv_w.shape
    K1 = KH * KW * C + 1
    HW = H * W
    BHW = B * HW
    N = centroids.shape[0]
    Npad = ((N + 127) // 128) * 128          # 1000 -> 1024: lane-dense output
    Bpad = ((B + 7) // 8) * 8                # 2 -> 8: unmasked sublane stores

    # --- static plumbing, executed exactly once (hoisted out of the hot path)
    w_aug = jnp.concatenate(
        [conv_w.reshape(KH * KW * C, D), conv_b.reshape(1, D)], axis=0)   # (K1, D)
    w_t = jnp.asarray(w_aug.T, jnp.float32)                               # (D, K1)

    pool = jnp.repeat(jnp.eye(B, dtype=jnp.float32), HW, axis=1) / float(HW)
    pool = jnp.pad(pool, ((0, Bpad - B), (0, 0)))                         # (Bpad, BHW)

    c_norm = centroids / jnp.sqrt(
        jnp.sum(centroids * centroids, axis=-1, keepdims=True) + 1e-12)
    c_norm = jnp.asarray(jnp.pad(c_norm, ((0, Npad - N), (0, 0))).T,
                         jnp.float32)                                      # (D, Npad)

    call = pl.pallas_call(
        hybrid_kernel,
        out_shape=jax.ShapeDtypeStruct((Bpad, Npad), jnp.float32),
        grid_spec=pltpu.PrefetchScalarGridSpec(
            num_scalar_prefetch=0,
            grid=(1,),
            in_specs=[
                pl.BlockSpec((K1, BHW), lambda i: (0, 0)),
                pl.BlockSpec((D, K1), lambda i: (0, 0)),
                pl.BlockSpec((Bpad, BHW), lambda i: (0, 0)),
                pl.BlockSpec((D, Npad), lambda i: (0, 0)),
            ],
            out_specs=pl.BlockSpec((Bpad, Npad), lambda i: (0, 0)),
        ),
        compiler_params=pltpu.CompilerParams(dimension_semantics=("arbitrary",)),
    )

    @jax.jit
    def forward(x_nhwc):
        patches_t = _im2col_3x3_t(x_nhwc)                 # activation-dependent only
        logits_pad = call(patches_t, w_t, pool, c_norm)   # (Bpad, Npad)
        return logits_pad[:B, :N]

    return forward


# ------------------------------- reference --------------------------------- #

def hybrid_reference(x_nhwc, conv_w, conv_b, centroids):
    y = lax.conv_general_dilated(
        x_nhwc, conv_w, (1, 1), "SAME",
        dimension_numbers=("NHWC", "HWIO", "NHWC")) + conv_b
    y = jnp.maximum(y, 0.0)
    f = jnp.mean(y, axis=(1, 2))
    fn = f / jnp.sqrt(jnp.sum(f * f, -1, keepdims=True) + 1e-12)
    cn = centroids / jnp.sqrt(jnp.sum(centroids * centroids, -1, keepdims=True) + 1e-12)
    return fn @ cn.T


# ---------------------------------- main ------------------------------------ #

if __name__ == "__main__":
    key = jax.random.PRNGKey(0)
    k_x, k_w, k_b, k_c = jax.random.split(key, 4)

    B, C, H, W = 2, 3, 16, 16        # PyTorch conv input is NCHW; kernel uses NHWC
    D = 32                           # feature_dim
    N = 1000                         # number of centroids (as in the module)

    x_nchw = jax.random.normal(k_x, (B, C, H, W), dtype=jnp.float32)
    x_nhwc = jnp.transpose(x_nchw, (0, 2, 3, 1))

    conv_w = jax.random.normal(k_w, (3, 3, C, D), dtype=jnp.float32) * 0.1   # HWIO
    conv_b = jax.random.normal(k_b, (D,), dtype=jnp.float32) * 0.1
    # Module initializes centroids to zeros (cosine sim degenerates to 0 via the
    # epsilon); use random values so the correctness check is non-degenerate.
    centroids = jax.random.normal(k_c, (N, D), dtype=jnp.float32)

    forward = make_hybrid_forward(conv_w, conv_b, centroids, B, H, W)
    logits = jax.block_until_ready(forward(x_nhwc))

    ref = hybrid_reference(x_nhwc, conv_w, conv_b, centroids)
    assert logits.shape == (B, N)
    max_err = float(jnp.max(jnp.abs(logits - ref)))
    assert jnp.allclose(logits, ref, rtol=2e-4, atol=2e-4), max_err
    print("KERNEL_OK")
</pallas_src>

<mosaic_0001>
module attributes {stable_mosaic.version = 11 : i64} {
  func.func @hybrid_kernel(%arg0: i32, %arg1: memref<28x512xf32, #tpu.memory_space<vmem>>, %arg2: memref<32x28xf32, #tpu.memory_space<vmem>>, %arg3: memref<8x512xf32, #tpu.memory_space<vmem>>, %arg4: memref<32x1024xf32, #tpu.memory_space<vmem>>, %arg5: memref<8x1024xf32, #tpu.memory_space<vmem>>) attributes {dimension_semantics = [#tpu.dimension_semantics<arbitrary>], iteration_bounds = array<i64: 1>, scalar_prefetch = 0 : i64, scratch_operands = 0 : i64, tpu.core_type = #tpu.core_type<tc>, window_params = [{pipeline_mode = #tpu.pipeline_mode<synchronous>, transform_indices = @transform_0, window_bounds = array<i64: 28, 512>}, {pipeline_mode = #tpu.pipeline_mode<synchronous>, transform_indices = @transform_1, window_bounds = array<i64: 32, 28>}, {pipeline_mode = #tpu.pipeline_mode<synchronous>, transform_indices = @transform_2, window_bounds = array<i64: 8, 512>}, {pipeline_mode = #tpu.pipeline_mode<synchronous>, transform_indices = @transform_3, window_bounds = array<i64: 32, 1024>}, {pipeline_mode = #tpu.pipeline_mode<synchronous>, transform_indices = @transform_4, window_bounds = array<i64: 8, 1024>}]} {
    %c0 = arith.constant 0 : index
    %c0_0 = arith.constant 0 : index
    %0 = vector.load %arg2[%c0, %c0_0] : memref<32x28xf32, #tpu.memory_space<vmem>>, vector<32x28xf32>
    %c0_1 = arith.constant 0 : index
    %c0_2 = arith.constant 0 : index
    %1 = vector.load %arg1[%c0_1, %c0_2] : memref<28x512xf32, #tpu.memory_space<vmem>>, vector<28x512xf32>
    %cst = arith.constant dense<0.000000e+00> : vector<32x512xf32>
    %2 = tpu.matmul %0, %1, %cst {dimension_numbers = #tpu.dot_dimension_numbers<[1], [0], [0], [1], [0, 0, 1, 1], [], []>} : vector<32x28xf32>, vector<28x512xf32>, vector<32x512xf32> -> vector<32x512xf32>
    %cst_3 = arith.constant 0.000000e+00 : f32
    %3 = vector.broadcast %cst_3 : f32 to vector<32x512xf32>
    %4 = arith.maximumf %2, %3 : vector<32x512xf32>
    %c0_4 = arith.constant 0 : index
    %c0_5 = arith.constant 0 : index
    %5 = vector.load %arg3[%c0_4, %c0_5] : memref<8x512xf32, #tpu.memory_space<vmem>>, vector<8x512xf32>
    %cst_6 = arith.constant dense<0.000000e+00> : vector<8x32xf32>
    %6 = tpu.matmul %5, %4, %cst_6 {dimension_numbers = #tpu.dot_dimension_numbers<[1], [1], [0], [0], [0, 0, 1, 0], [], []>} : vector<8x512xf32>, vector<32x512xf32>, vector<8x32xf32> -> vector<8x32xf32>
    %c0_7 = arith.constant 0 : index
    %c0_8 = arith.constant 0 : index
    %7 = vector.load %arg4[%c0_7, %c0_8] : memref<32x1024xf32, #tpu.memory_space<vmem>>, vector<32x1024xf32>
    %cst_9 = arith.constant dense<0.000000e+00> : vector<8x1024xf32>
    %8 = tpu.matmul %6, %7, %cst_9 {dimension_numbers = #tpu.dot_dimension_numbers<[1], [0], [0], [1], [0, 0, 1, 1], [], []>} : vector<8x32xf32>, vector<32x1024xf32>, vector<8x1024xf32> -> vector<8x1024xf32>
    %9 = arith.mulf %6, %6 : vector<8x32xf32>
    %cst_10 = arith.constant dense<0.000000e+00> : vector<8xf32>
    %10 = vector.multi_reduction <add>, %9, %cst_10 [1] : vector<8x32xf32> to vector<8xf32>
    %11 = vector.shape_cast %10 : vector<8xf32> to vector<8x1xf32>
    %cst_11 = arith.constant 9.99999996E-13 : f32
    %12 = vector.broadcast %cst_11 : f32 to vector<8x1xf32>
    %13 = arith.addf %11, %12 : vector<8x1xf32>
    %14 = math.rsqrt %13 : vector<8x1xf32>
    %15 = vector.broadcast %14 : vector<8x1xf32> to vector<8x1024xf32>
    %16 = arith.mulf %8, %15 : vector<8x1024xf32>
    %c0_12 = arith.constant 0 : index
    %c0_13 = arith.constant 0 : index
    %17 = vector.load %arg5[%c0_12, %c0_13] : memref<8x1024xf32, #tpu.memory_space<vmem>>, vector<8x1024xf32>
    tpu.vector_store %arg5[%c0_12, %c0_13], %16 {strides = array<i32>} : memref<8x1024xf32, #tpu.memory_space<vmem>>, vector<8x1024xf32>,
    return
  }
  func.func @transform_0(%arg0: i32) -> (i32, i32) {
    %c0_i32 = arith.constant 0 : i32
    %c0_i32_0 = arith.constant 0 : i32
    %c0_i32_1 = arith.constant 0 : i32
    return %c0_i32, %c0_i32_0 : i32, i32
  }
  func.func @transform_1(%arg0: i32) -> (i32, i32) {
    %c0_i32 = arith.constant 0 : i32
    %c0_i32_0 = arith.constant 0 : i32
    %c0_i32_1 = arith.constant 0 : i32
    return %c0_i32, %c0_i32_0 : i32, i32
  }
  func.func @transform_2(%arg0: i32) -> (i32, i32) {
    %c0_i32 = arith.constant 0 : i32
    %c0_i32_0 = arith.constant 0 : i32
    %c0_i32_1 = arith.constant 0 : i32
    return %c0_i32, %c0_i32_0 : i32, i32
  }
  func.func @transform_3(%arg0: i32) -> (i32, i32) {
    %c0_i32 = arith.constant 0 : i32
    %c0_i32_0 = arith.constant 0 : i32
    %c0_i32_1 = arith.constant 0 : i32
    return %c0_i32, %c0_i32_0 : i32, i32
  }
  func.func @transform_4(%arg0: i32) -> (i32, i32) {
    %c0_i32 = arith.constant 0 : i32
    %c0_i32_0 = arith.constant 0 : i32
    %c0_i32_1 = arith.constant 0 : i32
    return %c0_i32, %c0_i32_0 : i32, i32
  }
}

</mosaic_0001>

<bundles_post_ra>
// kernel: forward.1
= control target key start
LH: loop header
LB: loop body
LE: loop exit
PB: predicated region body
PF: predicated region fallthrough
CT: control target
= control target key end

     0   :  { %vm50_vm0 = vcmask 1043456   ;;  %v837_v3 = vmov 0.0   ;;  %vm838_vm1 = vmmov 1   ;;  %vm37_vm3 = vcmask 228352   ;;  %s1093_s0 = inlined_call_operand.vmem [shape: f32[28,512], index: 0, kind: input, shape index: {}]   ;;  %s1094_s1 = inlined_call_operand.vmem [shape: f32[32,28], index: 1, kind: input, shape index: {}]   ;;  %s1095_s2 = inlined_call_operand.vmem [shape: f32[8,512], index: 2, kind: input, shape index: {}]   ;;  %s1096_s3 = inlined_call_operand.vmem [shape: f32[32,1024], index: 3, kind: input, shape index: {}]   ;;  %s1097_s4 = inlined_call_operand.vmem [shape: f32[8,1024], index: 4, kind: output, shape index: {}]  }
   0x1   :  { %v22_v0 = vld [vmem:[%s1093_s0 + $0x8] sm:$0xff]  ;;  %v21_v2 = vld [vmem:[%s1093_s0] sm:$0xff]  ;;  %127 = vmatprep.mubr.f32.mxu0 %v837_v3  ;;  %216 = vmatprep.mubr.f32.mxu1 %v837_v3  ;;  %vm884_vm2 = vmpackc.low %vm50_vm0, %vm838_vm1  ;;  %vm433_vm4 = vcmask 261120  }
   0x2   :  { %v26_v1 = vld [vmem:[%s1093_s0 + $0x28] sm:$0xff]  ;;  %v25_v5 = vld [vmem:[%s1093_s0 + $0x20] sm:$0xff]  ;;  %v24_v13 = vld [vmem:[%s1093_s0 + $0x18] sm:$0xff] }
   0x3   :  { %v763_v4 = vpack.c.bf16 %v26_v1, %v22_v0  ;;  %v30_v6 = vld [vmem:[%s1093_s0 + $0x48] sm:$0xff]  ;;  %v765_v8 = vpack.c.bf16 %v25_v5, %v21_v2  ;;  %v29_v11 = vld [vmem:[%s1093_s0 + $0x40] sm:$0xff]  ;;  %v28_v14 = vld [vmem:[%s1093_s0 + $0x38] sm:$0xff] }
   0x4   :  { %v34_v7 = vld [vmem:[%s1093_s0 + $0x68] sm:$0xf]  ;;  %v33_v12 = vld [vmem:[%s1093_s0 + $0x60] sm:$0xf]  ;;  %v773_v16 = vpack.c.bf16 %v28_v14, %v24_v13  ;;  %v23_v17 = vld [vmem:[%s1093_s0 + $0x10] sm:$0xff] }
   0x5   :  { %v767_v9 = vpack.c.bf16 %v34_v7, %v30_v6  ;;  %764 = vmatprep.subr.bf16.mxu0 %v763_v4  ;;  %v770_v15 = vpack.c.bf16 %v33_v12, %v29_v11  ;;  %v27_v18 = vld [vmem:[%s1093_s0 + $0x30] sm:$0xff]  ;;  %v32_v20 = vld [vmem:[%s1093_s0 + $0x58] sm:$0xff]  ;;  %v17_v26 = vld [vmem:[%s1094_s1] sm:$0xff] }
   0x6   :  { %766 = vmatpush1.bf16.msra.mxu0 %v765_v8  ;;  %v775_v19 = vpack.c.bf16 %v27_v18, %v23_v17  ;;  %v36_v21 = vld [vmem:[%s1093_s0 + $0x78] sm:$0xf]  ;;  %774 = vmatprep.subr.bf16.mxu1 %v773_v16  ;;  %v31_v23 = vld [vmem:[%s1093_s0 + $0x50] sm:$0xff]  ;;  %v18_v27 = vld [vmem:[%s1094_s1 + $0x8] sm:$0xff] }
   0x7   :  { %769 = vmatprep.subr.msk.bf16.mxu0 %vm884_vm2, %v767_v9  ;;  %v777_v22 = vpack.c.bf16 %v36_v21, %v32_v20  ;;  %v35_v24 = vld [vmem:[%s1093_s0 + $0x70] sm:$0xf]  ;;  %v20_v29 = vld [vmem:[%s1094_s1 + $0x18] sm:$0xff]  ;;  %v258_v30 = vld [vmem:[%s1095_s2 + $0x8] sm:$0xff] }
   0x8   :  { %776 = vmatpush1.bf16.msra.mxu1 %v775_v19  ;;  %v780_v25 = vpack.c.bf16 %v35_v24, %v31_v23  ;;  %v19_v28 = vld [vmem:[%s1094_s1 + $0x10] sm:$0xff]  ;;  %v402_v31 = vld [vmem:[%s1096_s3 + $0x8] sm:$0xff]  ;;  %v401_v33 = vld [vmem:[%s1096_s3] sm:$0xff] }
   0x9   :  { %779 = vmatprep.subr.msk.bf16.mxu1 %vm884_vm2, %v777_v22  ;;  %v410_v32 = vld [vmem:[%s1096_s3 + $0x48] sm:$0xff]  ;;  %v409_v35 = vld [vmem:[%s1096_s3 + $0x40] sm:$0xff]  ;;  %v260_v21 = vld [vmem:[%s1095_s2 + $0x18] sm:$0xff] }
   0xa   :  { %772 = vmatpush1.bf16.msk.msra.mxu0 %vm884_vm2, %v770_v15  ;;  %v799_v34 = vpack.c.bf16 %v410_v32, %v402_v31  ;;  %v418_v36 = vld [vmem:[%s1096_s3 + $0x88] sm:$0xff]  ;;  %v801_v38 = vpack.c.bf16 %v409_v35, %v401_v33  ;;  %v417_v40 = vld [vmem:[%s1096_s3 + $0x80] sm:$0xff]  ;;  %v408_v22 = vld [vmem:[%s1096_s3 + $0x38] sm:$0xff] }
   0xb   :  { %v426_v37 = vld [vmem:[%s1096_s3 + $0xc8] sm:$0xff]  ;;  %v425_v41 = vld [vmem:[%s1096_s3 + $0xc0] sm:$0xff]  ;;  %v416_v23 = vld [vmem:[%s1096_s3 + $0x78] sm:$0xff] }
   0xc   :  { %782 = vmatpush1.bf16.msk.msra.mxu1 %vm884_vm2, %v780_v25  ;;  %v803_v39 = vpack.c.bf16 %v426_v37, %v418_v36  ;;  %v805_v42 = vpack.c.bf16 %v425_v41, %v417_v40  ;;  %v257_v20 = vld [vmem:[%s1095_s2] sm:$0xff]  ;;  %v823_v24 = vpack.c.bf16 %v416_v23, %v408_v22  ;;  %v407_v25 = vld [vmem:[%s1096_s3 + $0x30] sm:$0xff]  ;;  %v404_v35 = vld [vmem:[%s1096_s3 + $0x18] sm:$0xff] }
   0xd   :  { %749 = vmatmul.mubr.msk.f32.vlgmr.msra.gmra.mrb[0].mxu0 %vm37_vm3, %v17_v26  ;;  %800 = vmatprep.subr.bf16.mxu1 %v799_v34  ;;  %v423_v32 = vld [vmem:[%s1096_s3 + $0xb0] sm:$0xff]  ;;  %v412_v36 = vld [vmem:[%s1096_s3 + $0x58] sm:$0xff] }
   0xe   :  { %133 = vmatprep.mubr.f32.mxu0 %v837_v3  ;;  %v431_v33 = vld [vmem:[%s1096_s3 + $0xf0] sm:$0xff]  ;;  %v807_v37 = vpack.c.bf16 %v412_v36, %v404_v35  ;;  %v420_v40 = vld [vmem:[%s1096_s3 + $0x98] sm:$0xff] }
   0xf   :  { %755 = vmatmul.mubr.msk.f32.vlgmr.msra.gmra.mrb[0].mxu1 %vm37_vm3, %v17_v26  ;;  %v415_v26 = vld [vmem:[%s1096_s3 + $0x70] sm:$0xff]  ;;  %v829_v34 = vpack.c.bf16 %v431_v33, %v423_v32  ;;  %v428_v41 = vld [vmem:[%s1096_s3 + $0xd8] sm:$0xff] }
  0x10   :  { %222 = vmatprep.mubr.f32.mxu1 %v837_v3  ;;  %802 = vmatpush1.bf16.msra.mxu1 %v801_v38  ;;  %v403_v38 = vld [vmem:[%s1096_s3 + $0x10] sm:$0xff] }
  0x11   :  { %750 = vmatmul.mubr.msk.f32.gmra.mrb[2].mxu0 %vm37_vm3, %v18_v27  ;;  %804 = vmatprep.subr.bf16.mxu1 %v803_v39  ;;  %v411_v39 = vld [vmem:[%s1096_s3 + $0x50] sm:$0xff] }
  0x12   :  { %139 = vmatprep.mubr.f32.mxu0 %v837_v3 }
  0x13   :  { %756 = vmatmul.mubr.msk.f32.gmra.mrb[2].mxu1 %vm37_vm3, %v18_v27  ;;  %v424_v27 = vld [vmem:[%s1096_s3 + $0xb8] sm:$0xff] }
  0x14   :  { %228 = vmatprep.mubr.f32.mxu1 %v837_v3  ;;  %806 = vmatpush1.bf16.msra.mxu1 %v805_v42  ;;  %v809_v42 = vpack.c.bf16 %v411_v39, %v403_v38 }
  0x15   :  { %751 = vmatmul.mubr.msk.f32.gmra.mrb[4].mxu0 %vm37_vm3, %v19_v28  ;;  %808 = vmatprep.subr.bf16.mxu1 %v807_v37 }
  0x16   :  { %145 = vmatprep.mubr.f32.mxu0 %v837_v3 }
  0x17   :  { %757 = vmatmul.mubr.msk.f32.gmra.mrb[4].mxu1 %vm37_vm3, %v19_v28  ;;  %v432_v28 = vld [vmem:[%s1096_s3 + $0xf8] sm:$0xff] }
  0x18   :  { %234 = vmatprep.mubr.f32.mxu1 %v837_v3  ;;  %v827_v31 = vpack.c.bf16 %v432_v28, %v424_v27 }
  0x19   :  { %752 = vmatmul.mubr.msk.f32.gmra.mrb[6].mxu0 %vm37_vm3, %v20_v29 }
  0x1a   :  { %325 = vmatprep.mubr.f32.mxu0 %v258_v30  ;;  %v825_v30 = vpack.c.bf16 %v415_v26, %v407_v25 }
  0x1b   :  { %758 = vmatmul.mubr.msk.f32.gmra.mrb[6].mxu1 %vm37_vm3, %v20_v29  ;;  %v259_v29 = vld [vmem:[%s1095_s2 + $0x10] sm:$0xff] }
  0x1c   :  { %501 = vmatprep.mubr.f32.mxu1 %v837_v3 }
  0xe0   :  { %v129_v43 = vpop.f32.mrb[0].mxu0 }
  0xe1   :  { %v131_v44 = vpop.f32.mrb[1].mxu0  ;;  %v241_v48 = vmax.f32 %v129_v43, 0.0  ;;  %v811_v43 = vpack.c.bf16 %v428_v41, %v420_v40 }
  0xe2   :  { %v218_v45 = vpop.f32.mrb[0].mxu1  ;;  %v242_v51 = vmax.f32 %v131_v44, 0.0  ;;  %v419_v44 = vld [vmem:[%s1096_s3 + $0x90] sm:$0xff] }
  0xe3   :  { %v220_v47 = vpop.f32.mrb[1].mxu1  ;;  %v243_v53 = vmax.f32 %v218_v45, 0.0  ;;  %v427_v45 = vld [vmem:[%s1096_s3 + $0xd0] sm:$0xff] }
  0xe4   :  { %v135_v46 = vpop.f32.mrb[2].mxu0  ;;  %v244_v55 = vmax.f32 %v220_v47, 0.0  ;;  %v406_v47 = vld [vmem:[%s1096_s3 + $0x28] sm:$0xff] }
  0xe5   :  { %v245_v49 = vmax.f32 %v135_v46, 0.0  ;;  %v137_v50 = vpop.f32.mrb[3].mxu0 }
  0xe6   :  { %v246_v52 = vmax.f32 %v137_v50, 0.0  ;;  %v224_v56 = vpop.f32.mrb[2].mxu1 }
  0xe7   :  { %v785_v54 = vpack.c.bf16 %v245_v49, %v241_v48  ;;  %v247_v59 = vmax.f32 %v224_v56, 0.0  ;;  %v226_v60 = vpop.f32.mrb[3].mxu1  ;;  %v414_v48 = vld [vmem:[%s1096_s3 + $0x68] sm:$0xff] }
  0xe8   :  { %v783_v57 = vpack.c.bf16 %v246_v52, %v242_v51  ;;  %v141_v58 = vpop.f32.mrb[4].mxu0  ;;  %v248_v62 = vmax.f32 %v226_v60, 0.0  ;;  %v813_v51 = vpack.c.bf16 %v427_v45, %v419_v44  ;;  %v422_v56 = vld [vmem:[%s1096_s3 + $0xa8] sm:$0xff]  ;;  %v421_v60 = vld [vmem:[%s1096_s3 + $0xa0] sm:$0xff] }
  0xe9   :  { %v143_v61 = vpop.f32.mrb[5].mxu0  ;;  %v793_v63 = vpack.c.bf16 %v247_v59, %v243_v53  ;;  %v249_v5 = vmax.f32 %v141_v58, 0.0  ;;  %v815_v53 = vpack.c.bf16 %v414_v48, %v406_v47 }
  0xea   :  { %784 = vmatprep.subr.bf16.mxu0 %v783_v57  ;;  %v791_v0 = vpack.c.bf16 %v248_v62, %v244_v55  ;;  %v230_v1 = vpop.f32.mrb[4].mxu1  ;;  %v250_v8 = vmax.f32 %v143_v61, 0.0  ;;  %v413_v55 = vld [vmem:[%s1096_s3 + $0x60] sm:$0xff]  ;;  %v430_v57 = vld [vmem:[%s1096_s3 + $0xe8] sm:$0xff] }
  0xeb   :  { %786 = vmatpush1.bf16.xpose.msra.mxu0 %v785_v54  ;;  %v232_v4 = vpop.f32.mrb[5].mxu1  ;;  %v251_v10 = vmax.f32 %v230_v1, 0.0  ;;  %v405_v54 = vld [vmem:[%s1096_s3 + $0x20] sm:$0xff]  ;;  %v819_v59 = vpack.c.bf16 %v430_v57, %v422_v56 }
  0xec   :  { %v147_v2 = vpop.f32.mrb[6].mxu0  ;;  %v252_v12 = vmax.f32 %v232_v4, 0.0  ;;  %v817_v58 = vpack.c.bf16 %v413_v55, %v405_v54  ;;  %v429_v61 = vld [vmem:[%s1096_s3 + $0xe0] sm:$0xff] }
  0xed   :  { %v253_v6 = vmax.f32 %v147_v2, 0.0  ;;  %v149_v7 = vpop.f32.mrb[7].mxu0  ;;  %v821_v62 = vpack.c.bf16 %v429_v61, %v421_v60 }
  0xee   :  { %v254_v9 = vmax.f32 %v149_v7, 0.0  ;;  %v236_v13 = vpop.f32.mrb[6].mxu1 }
  0xef   :  { %v789_v11 = vpack.c.bf16 %v253_v6, %v249_v5  ;;  %v255_v15 = vmax.f32 %v236_v13, 0.0  ;;  %v238_v16 = vpop.f32.mrb[7].mxu1 }
  0xf0   :  { %v787_v14 = vpack.c.bf16 %v254_v9, %v250_v8  ;;  %v256_v17 = vmax.f32 %v238_v16, 0.0 }
  0xf1   :  { %v797_v18 = vpack.c.bf16 %v255_v15, %v251_v10 }
  0xf2   :  { %788 = vmatprep.subr.bf16.mxu0 %v787_v14  ;;  %v795_v19 = vpack.c.bf16 %v256_v17, %v252_v12 }
  0xf3   :  { %790 = vmatpush1.bf16.xpose.msra.mxu0 %v789_v11 }
  0xf4   :  { %792 = vmatprep.subr.bf16.mxu0 %v791_v0 }
  0xfa   :  { %326 = vmatmul.mubr.f32.vlgmr.msra.gmra.mrb[8].mxu0 %v257_v20 }
  0xfb   :  { %794 = vmatpush1.bf16.xpose.msra.mxu0 %v793_v63  ;;  %395 = vmatprep.mubr.f32.mxu0 %v260_v21 }
  0xfc   :  { %796 = vmatprep.subr.bf16.mxu0 %v795_v19 }
 0x103   :  { %798 = vmatpush1.bf16.xpose.msra.mxu0 %v797_v18 }
 0x104   :  { %824 = vmatprep.subr.bf16.mxu0 %v823_v24 }
 0x10a   :  { %396 = vmatmul.mubr.f32.vlgmr.msra.gmra.mrb[8].mxu0 %v259_v29 }
 0x10b   :  { %826 = vmatpush1.bf16.msra.mxu0 %v825_v30  ;;  %714 = vmatprep.mubr.f32.mxu0 %v837_v3 }
 0x10c   :  { %828 = vmatprep.subr.bf16.mxu0 %v827_v31 }
 0x10f   :  { %830 = vmatpush1.bf16.msra.mxu0 %v829_v34 }
 0x1dd   :  { %v397_v46 = vpop.f32.mrb[8].mxu0 }
 0x1de   :  { %v399_v49 = vpop.f32.mrb[9].mxu0  ;;  %759 = vmatmul.mubr.msk.f32.vlgmr.msra.gmra.mrb[8].mxu1 %vm433_vm4, %v397_v46  ;;  %762 = vmatmul.mubr.msk.f32.vlgmr.msra.gmra.mrb[10].mxu0 %vm433_vm4, %v397_v46  ;;  %v721_v50 = vmul.f32 %v397_v46, %v397_v46 }
 0x1df   :  { %810 = vmatpush1.bf16.msra.mxu1 %v809_v42  ;;  %572 = vmatprep.mubr.f32.mxu1 %v837_v3 }
 0x1e0   :  { %812 = vmatprep.subr.bf16.mxu1 %v811_v43  ;;  %v722_v52 = vsel %vm433_vm4, %v721_v50, 0.0 }
 0x1e1   :  { %723 = vadd.xlane.f32.xlu0 %v722_v52 }
 0x1e3   :  { %814 = vmatpush1.bf16.msra.mxu1 %v813_v51 }
 0x1e4   :  { %816 = vmatprep.subr.bf16.mxu1 %v815_v53 }
 0x1e6   :  { %760 = vmatmul.mubr.msk.f32.vlgmr.msra.gmra.mrb[10].mxu1 %vm433_vm4, %v397_v46 }
 0x1e7   :  { %818 = vmatpush1.bf16.msra.mxu1 %v817_v58  ;;  %643 = vmatprep.mubr.f32.mxu1 %v837_v3 }
 0x1e8   :  { %820 = vmatprep.subr.bf16.mxu1 %v819_v59 }
 0x1eb   :  { %822 = vmatpush1.bf16.msra.mxu1 %v821_v62 }
 0x1ee   :  { %761 = vmatmul.mubr.msk.f32.vlgmr.msra.gmra.mrb[12].mxu1 %vm433_vm4, %v397_v46 }
 0x26e   :  { %v724_v63 = vpop.xlane.xlu0 %723 }
 0x26f   :  { %v725_v0 = vadd.f32 1e-12, %v724_v63 }
 0x271   :  { %835 = vrsqrt.f32 %v725_v0 }
 0x27b   :  { %v836_v1 = vpop.eup %835 }
 0x2b1   :  { %v503_v2 = vpop.f32.mrb[8].mxu1  ;;  %v716_v4 = vpop.f32.mrb[10].mxu0 }
 0x2b2   :  { %v727_v5 = vmul.f32 %v836_v1, %v503_v2  ;;  %v733_v6 = vmul.f32 %v836_v1, %v716_v4  ;;  %v505_v7 = vpop.f32.mrb[9].mxu1  ;;  %v718_v8 = vpop.f32.mrb[11].mxu0 }
 0x2b3   :  { %v728_v9 = vmul.f32 %v836_v1, %v505_v7  ;;  %v734_v10 = vmul.f32 %v836_v1, %v718_v8 }
 0x2b4   :  { %735 = vst [vmem:[%s1097_s4] sm:$0xff] %v727_v5  ;;  %741 = vst [vmem:[%s1097_s4 + $0x30] sm:$0xff] %v733_v6 }
 0x2b5   :  { %736 = vst [vmem:[%s1097_s4 + $0x8] sm:$0xff] %v728_v9  ;;  %742 = vst [vmem:[%s1097_s4 + $0x38] sm:$0xff] %v734_v10 }
 0x2b9   :  { %v574_v3 = vpop.f32.mrb[10].mxu1 }
 0x2ba   :  { %v729_v11 = vmul.f32 %v836_v1, %v574_v3  ;;  %v576_v12 = vpop.f32.mrb[11].mxu1 }
 0x2bb   :  { %v730_v13 = vmul.f32 %v836_v1, %v576_v12 }
 0x2bc   :  { %737 = vst [vmem:[%s1097_s4 + $0x10] sm:$0xff] %v729_v11 }
 0x2bd   :  { %738 = vst [vmem:[%s1097_s4 + $0x18] sm:$0xff] %v730_v13 }
 0x2c1   :  { %v645_v14 = vpop.f32.mrb[12].mxu1 }
 0x2c2   :  { %v731_v15 = vmul.f32 %v836_v1, %v645_v14  ;;  %v647_v16 = vpop.f32.mrb[13].mxu1 }
 0x2c3   :  { %v732_v17 = vmul.f32 %v836_v1, %v647_v16 }
 0x2c4   :  { %739 = vst [vmem:[%s1097_s4 + $0x20] sm:$0xff] %v731_v15 }
 0x2c5   :  { %740 = vst [vmem:[%s1097_s4 + $0x28] sm:$0xff] %v732_v17 }

</bundles_post_ra>
